<compile_context>
chip_gen: v7x
topology: tpu7x:2x2x1
jax: 0.10.0
libtpu: 0.0.40
codegen_flags: <defaults>
</compile_context>

<pallas_src>
import functools

import jax
import jax.numpy as jnp
from jax import lax
from jax.experimental import pallas as pl
from jax.experimental.pallas import tpu as pltpu


# ----------------------------------------------------------------------------
# Tiled linear kernel:  y = x @ W + b
# ----------------------------------------------------------------------------
def _linear_kernel(x_ref, w_ref, b_ref, o_ref, acc_ref):
    @pl.when(pl.program_id(2) == 0)
    def _():
        acc_ref[...] = jnp.zeros_like(acc_ref)

    acc_ref[...] += jnp.dot(x_ref[...], w_ref[...],
                            preferred_element_type=jnp.float32)

    @pl.when(pl.program_id(2) == pl.num_programs(2) - 1)
    def _():
        o_ref[...] = (acc_ref[...] + b_ref[...]).astype(o_ref.dtype)


def linear_pallas(x, w, b, *, out_dtype=None, tm=256, tn=256, tk=256):
    """x: (M, Din), w: (Din, Dout), b: (Dout,) -> (M, Dout)."""
    M, Kdim = x.shape
    _, N = w.shape
    out_dtype = out_dtype or x.dtype
    tm, tn, tk = min(tm, M), min(tn, N), min(tk, Kdim)
    # Tiles sized well under the 32 MiB default scoped-VMEM limit (and the
    # 64 MiB v7x physical VMEM) even with double buffering.
    assert M % tm == 0 and N % tn == 0 and Kdim % tk == 0, \
        "demo kernel assumes dims divisible by tile sizes"
    grid = (M // tm, N // tn, Kdim // tk)
    return pl.pallas_call(
        _linear_kernel,
        out_shape=jax.ShapeDtypeStruct((M, N), out_dtype),
        grid_spec=pltpu.PrefetchScalarGridSpec(
            num_scalar_prefetch=0,
            grid=grid,
            in_specs=[
                pl.BlockSpec((tm, tk), lambda i, j, k: (i, k)),
                pl.BlockSpec((tk, tn), lambda i, j, k: (k, j)),
                pl.BlockSpec((1, tn), lambda i, j, k: (0, j)),
            ],
            out_specs=pl.BlockSpec((tm, tn), lambda i, j, k: (i, j)),
            scratch_shapes=[pltpu.VMEM((tm, tn), jnp.float32)],
        ),
        compiler_params=pltpu.CompilerParams(
            dimension_semantics=("parallel", "parallel", "arbitrary")),
    )(x, w, b.reshape(1, N))


# ----------------------------------------------------------------------------
# Flash attention with fused head-merge + output projection (wO, bO)
# ----------------------------------------------------------------------------
def _flash_attn_wo_kernel(q_ref, k_ref, v_ref, wo_ref, bo_ref, o_ref,
                          m_scr, l_scr, acc_scr, out_scr, *, scale):
    h = pl.program_id(2)
    kv = pl.program_id(3)
    nh = pl.num_programs(2)
    nk = pl.num_programs(3)

    @pl.when(jnp.logical_and(h == 0, kv == 0))
    def _():
        out_scr[...] = jnp.zeros_like(out_scr)

    @pl.when(kv == 0)
    def _():
        m_scr[...] = jnp.full_like(m_scr, -jnp.inf)
        l_scr[...] = jnp.zeros_like(l_scr)
        acc_scr[...] = jnp.zeros_like(acc_scr)

    q = q_ref[0] * scale                       # (tq, d)  scale folded into q
    k = k_ref[0]                               # (tk, d)
    v = v_ref[0]                               # (tk, d)

    # scores: contract the minor dims directly (no k.T relayout)
    s = lax.dot_general(q, k, (((1,), (1,)), ((), ())),
                        preferred_element_type=jnp.float32)   # (tq, tk) f32

    m_prev = m_scr[...]                                        # (tq, 1)
    m_new = jnp.maximum(m_prev, jnp.max(s, axis=-1, keepdims=True))
    alpha = jnp.exp(m_prev - m_new)
    p = jnp.exp(s - m_new)                                     # (tq, tk) f32
    l_scr[...] = alpha * l_scr[...] + jnp.sum(p, axis=-1, keepdims=True)
    acc_scr[...] = alpha * acc_scr[...] + jnp.dot(
        p.astype(v.dtype), v, preferred_element_type=jnp.float32)
    m_scr[...] = m_new

    # end of kv loop for this head: normalize and fold this head's wO slice in
    @pl.when(kv == nk - 1)
    def _():
        ctx = acc_scr[...] * pl.reciprocal(l_scr[...], approx=True)   # (tq, d)
        out_scr[...] += jnp.dot(ctx.astype(wo_ref.dtype), wo_ref[...],
                                preferred_element_type=jnp.float32)   # (tq, D)

    # last head & last kv tile: add bias, lane-dense (tq, D) store
    @pl.when(jnp.logical_and(h == nh - 1, kv == nk - 1))
    def _():
        o_ref[0] = (out_scr[...] + bo_ref[...]).astype(o_ref.dtype)


def flash_attention_wo(q, k, v, wo, bo, *, H, d, tq=128, tkv=128):
    """q, k, v: (B, L, H*d); wo: (H*d, H*d); bo: (H*d,) -> (B, L, H*d) f32.

    Computes wO( merge_heads( softmax(q_h k_h^T * d**-0.5) v_h ) ) + bO.
    """
    B, L, D = q.shape
    assert D == H * d
    assert d % 128 == 0, "fused head-slicing path requires lane-aligned heads"
    tq, tkv = min(tq, L), min(tkv, L)
    assert L % tq == 0 and L % tkv == 0
    nq, nk = L // tq, L // tkv
    scale = float(d) ** -0.5

    head_q_spec = pl.BlockSpec((1, tq, d), lambda b, qi, h, kv: (b, qi, h))
    head_kv_spec = pl.BlockSpec((1, tkv, d), lambda b, qi, h, kv: (b, kv, h))

    return pl.pallas_call(
        functools.partial(_flash_attn_wo_kernel, scale=scale),
        out_shape=jax.ShapeDtypeStruct((B, L, D), jnp.float32),
        grid_spec=pltpu.PrefetchScalarGridSpec(
            num_scalar_prefetch=0,
            grid=(B, nq, H, nk),                     # reductions (h, kv) last
            in_specs=[
                head_q_spec,                                    # q
                head_kv_spec,                                   # k
                head_kv_spec,                                   # v
                pl.BlockSpec((d, D), lambda b, qi, h, kv: (h, 0)),   # wO rows
                pl.BlockSpec((1, D), lambda b, qi, h, kv: (0, 0)),   # bO
            ],
            out_specs=pl.BlockSpec((1, tq, D), lambda b, qi, h, kv: (b, qi, 0)),
            scratch_shapes=[
                pltpu.VMEM((tq, 1), jnp.float32),    # m (running max)
                pltpu.VMEM((tq, 1), jnp.float32),    # l (running sum)
                pltpu.VMEM((tq, d), jnp.float32),    # per-head context acc
                pltpu.VMEM((tq, D), jnp.float32),    # wO-projected output acc
            ],
        ),
        compiler_params=pltpu.CompilerParams(
            dimension_semantics=("parallel", "parallel", "arbitrary",
                                 "arbitrary")),
    )(q, k, v, wo, bo.reshape(1, D))


# ----------------------------------------------------------------------------
# Module wrapper
# ----------------------------------------------------------------------------
def nocache_self_attention(Q, K, V, params, H, d, *,
                           compute_dtype=jnp.float32):
    """NoCacheSelfAttention.forward (eval mode).

    compute_dtype=jnp.bfloat16 runs MXU matmuls bf16-in / f32-accumulate
    (softmax statistics and accumulators stay f32) — recommended on v6e/v7x.
    """
    B, L, D = Q.shape
    assert D == H * d

    def proj(x, w, b):
        y = linear_pallas(x.reshape(B * L, D), w, b, out_dtype=compute_dtype)
        return y.reshape(B, L, D)        # stays (B, L, H*d): no transposes

    q = proj(Q, params["wQ"], params["bQ"])
    k = proj(K, params["wK"], params["bK"])
    v = proj(V, params["wV"], params["bV"])

    wo = params["wO"].astype(compute_dtype)
    return flash_attention_wo(q, k, v, wo, params["bO"], H=H, d=d)


# ----------------------------------------------------------------------------
# Pure-JAX reference (same math) for a sanity check
# ----------------------------------------------------------------------------
def reference(Q, K, V, params, H, d):
    B, L, D = Q.shape

    def proj(x, w, b):
        return (x.reshape(B * L, D) @ w + b).reshape(B, L, H, d).transpose(0, 2, 1, 3)

    q = proj(Q, params["wQ"], params["bQ"])
    k = proj(K, params["wK"], params["bK"])
    v = proj(V, params["wV"], params["bV"])
    s = jnp.einsum("bhqd,bhkd->bhqk", q, k) * (d ** -0.5)
    p = jax.nn.softmax(s, axis=-1)
    o = jnp.einsum("bhqk,bhkd->bhqd", p, v)
    o = o.transpose(0, 2, 1, 3).reshape(B * L, D)
    return (o @ params["wO"] + params["bO"]).reshape(B, L, D)


# ----------------------------------------------------------------------------
# Main
# ----------------------------------------------------------------------------
if __name__ == "__main__":
    B, L, H, d = 2, 256, 2, 128      # lane-aligned head dim; small overall
    D = H * d

    key = jax.random.PRNGKey(0)
    kq, kk, kv_key, *pkeys = jax.random.split(key, 3 + 8)

    Q = jax.random.normal(kq, (B, L, D), dtype=jnp.float32)
    K = jax.random.normal(kk, (B, L, D), dtype=jnp.float32)
    V = jax.random.normal(kv_key, (B, L, D), dtype=jnp.float32)

    # Deterministic nn.Linear-style parameters (weights stored as [in, out]).
    bound = 1.0 / (D ** 0.5)
    params = {}
    for i, name in enumerate(["Q", "K", "V", "O"]):
        params["w" + name] = jax.random.uniform(
            pkeys[2 * i], (D, D), minval=-bound, maxval=bound, dtype=jnp.float32)
        params["b" + name] = jax.random.uniform(
            pkeys[2 * i + 1], (D,), minval=-bound, maxval=bound, dtype=jnp.float32)

    ref = reference(Q, K, V, params, H, d)

    # f32 path (exact semantics of the PyTorch module)
    out = nocache_self_attention(Q, K, V, params, H, d)
    out = jax.block_until_ready(out)
    assert out.shape == (B, L, D)
    assert bool(jnp.all(jnp.isfinite(out)))
    assert bool(jnp.allclose(out, ref, atol=1e-2, rtol=1e-2))

    # bf16-in / f32-accumulate path (v6e/v7x MXU-friendly); looser tolerance.
    out_bf16 = nocache_self_attention(Q, K, V, params, H, d,
                                      compute_dtype=jnp.bfloat16)
    out_bf16 = jax.block_until_ready(out_bf16)
    assert bool(jnp.all(jnp.isfinite(out_bf16)))
    assert bool(jnp.allclose(out_bf16, ref, atol=5e-2, rtol=5e-2))

    print("KERNEL_OK")
</pallas_src>

<mosaic_0001>
module attributes {stable_mosaic.version = 11 : i64} {
  func.func @_linear_kernel(%arg0: i32, %arg1: i32, %arg2: i32, %arg3: memref<256x256xf32, #tpu.memory_space<vmem>>, %arg4: memref<256x256xf32, #tpu.memory_space<vmem>>, %arg5: memref<1x256xf32, #tpu.memory_space<vmem>>, %arg6: memref<256x256xf32, #tpu.memory_space<vmem>>, %arg7: memref<256x256xf32, #tpu.memory_space<vmem>>) attributes {dimension_semantics = [#tpu.dimension_semantics<parallel>, #tpu.dimension_semantics<parallel>, #tpu.dimension_semantics<arbitrary>], iteration_bounds = array<i64: 2, 1, 1>, scalar_prefetch = 0 : i64, scratch_operands = 1 : i64, tpu.core_type = #tpu.core_type<tc>, window_params = [{transform_indices = @transform_0, window_bounds = array<i64: 256, 256>}, {transform_indices = @transform_1, window_bounds = array<i64: 256, 256>}, {transform_indices = @transform_2, window_bounds = array<i64: 1, 256>}, {transform_indices = @transform_3, window_bounds = array<i64: 256, 256>}]} {
    %c0_i32 = arith.constant 0 : i32
    %0 = arith.cmpi eq, %arg2, %c0_i32 : i32
    %1 = arith.extui %0 : i1 to i32
    %c0_i32_0 = arith.constant 0 : i32
    %2 = arith.cmpi ne, %1, %c0_i32_0 : i32
    scf.if %2 {
      %cst_10 = arith.constant 0.000000e+00 : f32
      %12 = vector.broadcast %cst_10 : f32 to vector<256x256xf32>
      %c0_11 = arith.constant 0 : index
      %c0_12 = arith.constant 0 : index
      %13 = vector.load %arg7[%c0_11, %c0_12] : memref<256x256xf32, #tpu.memory_space<vmem>>, vector<256x256xf32>
      tpu.vector_store %arg7[%c0_11, %c0_12], %12 {strides = array<i32>} : memref<256x256xf32, #tpu.memory_space<vmem>>, vector<256x256xf32>,
    } else {
    }
    %c0 = arith.constant 0 : index
    %c0_1 = arith.constant 0 : index
    %3 = vector.load %arg7[%c0, %c0_1] : memref<256x256xf32, #tpu.memory_space<vmem>>, vector<256x256xf32>
    %c0_2 = arith.constant 0 : index
    %c0_3 = arith.constant 0 : index
    %4 = vector.load %arg3[%c0_2, %c0_3] : memref<256x256xf32, #tpu.memory_space<vmem>>, vector<256x256xf32>
    %c0_4 = arith.constant 0 : index
    %c0_5 = arith.constant 0 : index
    %5 = vector.load %arg4[%c0_4, %c0_5] : memref<256x256xf32, #tpu.memory_space<vmem>>, vector<256x256xf32>
    %cst = arith.constant dense<0.000000e+00> : vector<256x256xf32>
    %6 = tpu.matmul %4, %5, %cst {dimension_numbers = #tpu.dot_dimension_numbers<[1], [0], [0], [1], [0, 0, 1, 1], [], []>} : vector<256x256xf32>, vector<256x256xf32>, vector<256x256xf32> -> vector<256x256xf32>
    %7 = arith.addf %3, %6 : vector<256x256xf32>
    %c0_6 = arith.constant 0 : index
    %c0_7 = arith.constant 0 : index
    %8 = vector.load %arg7[%c0_6, %c0_7] : memref<256x256xf32, #tpu.memory_space<vmem>>, vector<256x256xf32>
    tpu.vector_store %arg7[%c0_6, %c0_7], %7 {strides = array<i32>} : memref<256x256xf32, #tpu.memory_space<vmem>>, vector<256x256xf32>,
    %c0_i32_8 = arith.constant 0 : i32
    %9 = arith.cmpi eq, %arg2, %c0_i32_8 : i32
    %10 = arith.extui %9 : i1 to i32
    %c0_i32_9 = arith.constant 0 : i32
    %11 = arith.cmpi ne, %10, %c0_i32_9 : i32
    scf.if %11 {
      %c0_10 = arith.constant 0 : index
      %c0_11 = arith.constant 0 : index
      %12 = vector.load %arg7[%c0_10, %c0_11] : memref<256x256xf32, #tpu.memory_space<vmem>>, vector<256x256xf32>
      %c0_12 = arith.constant 0 : index
      %c0_13 = arith.constant 0 : index
      %13 = vector.load %arg5[%c0_12, %c0_13] : memref<1x256xf32, #tpu.memory_space<vmem>>, vector<1x256xf32>
      %14 = vector.broadcast %13 : vector<1x256xf32> to vector<256x256xf32>
      %15 = arith.addf %12, %14 : vector<256x256xf32>
      %c0_14 = arith.constant 0 : index
      %c0_15 = arith.constant 0 : index
      %16 = vector.load %arg6[%c0_14, %c0_15] : memref<256x256xf32, #tpu.memory_space<vmem>>, vector<256x256xf32>
      tpu.vector_store %arg6[%c0_14, %c0_15], %15 {strides = array<i32>} : memref<256x256xf32, #tpu.memory_space<vmem>>, vector<256x256xf32>,
    } else {
    }
    return
  }
  func.func @transform_0(%arg0: i32, %arg1: i32, %arg2: i32) -> (i32, i32) {
    %c0_i32 = arith.constant 0 : i32
    return %arg0, %arg2 : i32, i32
  }
  func.func @transform_1(%arg0: i32, %arg1: i32, %arg2: i32) -> (i32, i32) {
    %c0_i32 = arith.constant 0 : i32
    return %arg2, %arg1 : i32, i32
  }
  func.func @transform_2(%arg0: i32, %arg1: i32, %arg2: i32) -> (i32, i32) {
    %c0_i32 = arith.constant 0 : i32
    %c0_i32_0 = arith.constant 0 : i32
    return %c0_i32, %arg1 : i32, i32
  }
  func.func @transform_3(%arg0: i32, %arg1: i32, %arg2: i32) -> (i32, i32) {
    %c0_i32 = arith.constant 0 : i32
    return %arg0, %arg1 : i32, i32
  }
}

</mosaic_0001>

<bundles_post_ra>
// kernel: tpu_custom_call.1
= control target key start
LH: loop header
LB: loop body
LE: loop exit
PB: predicated region body
PF: predicated region fallthrough
CT: control target
= control target key end

     0   :  { %8 = vsyncpa [#allocation4], 0  ;;  %s2057_s0 = inlined_call_operand.hbm [shape: f32[512,256], index: 0, kind: input, shape index: {}]   ;;  %s2058_s1 = inlined_call_operand.hbm [shape: f32[256,256], index: 1, kind: input, shape index: {}]   ;;  %s2059_s2 = inlined_call_operand.vmem [shape: f32[1,256], index: 2, kind: input, shape index: {}]   ;;  %s2060_s3 = inlined_call_operand.hbm [shape: f32[512,256], index: 3, kind: output, shape index: {}]  }
   0x1   :  { %10 = vsyncpa [#allocation4 + $0x1], 0 }
   0x2   :  { %11 = vsyncpa [#allocation7], 0 }
   0x3   :  { %12 = vsyncpa [#allocation5], 0 }
   0x4   :  { %14 = vsyncpa [#allocation5 + $0x1], 0  ;;  %s1624_s12 = smov 0   ;;  %s1626_s13 = smov 0  }
   0x5   :  { %s1628_s14 = smov 0   ;;  %s1630_s15 = smov 0  }
   0x6   :  { %s1632_s16 = smov 0   ;;  %s1634_s17 = smov 0  }
   0x7 LB: > { %s1254_s18 = sadd.s32 4294967295, %s1595_s17   ;;  %s1255_s19 = sadd.s32 4294967294, %s1595_s17   ;;  %s1595_s17 = sphi %s1634_s17, %s20_s17   ;;  %s1591_s16 = sphi %s1632_s16, %s2084_s16   ;;  %s1587_s15 = sphi %s1630_s15, %s2083_s15   ;;  %s1583_s14 = sphi %s1628_s14, %s2082_s14   ;;  %s1579_s13 = sphi %s1626_s13, %s2081_s13   ;;  %s1575_s12 = sphi %s1624_s12, %s2080_s12  }
   0x8   : > { %p61_p0 = scmp.ne.s32.totalorder %s1579_s13, %s1575_s12  ;;  %p1658_p1 = scmp.eq.s32.totalorder %s1254_s18, 0 }
   0x9   : > { %p1662_p2 = scmp.eq.s32.totalorder %s1254_s18, 1  ;;  %p147_p3 = scmp.eq.s32.totalorder %s1255_s19, 1 }
   0xa   : > { %s2065_s20 = scalar_select %p1658_p1, 1, 0 }
   0xb   : > { %s2066_s21 = scalar_select %p1662_p2, 1, 0 }
   0xc   : > { %p1668_p4 = por %p1658_p1, %p61_p0  ;;  %p1256_p5 = scmp.ge.s32.totalorder %s1595_s17, 1 }
   0xd   : > { %p1673_p6 = por %p147_p3, %p61_p0  ;;  %p154_p7 = scmp.lt.s32.totalorder %s1595_s17, 3 }
   0xe   : > { %s2067_s22 = scalar_select %p1668_p4, 1, 0 }
   0xf   : > { %s2068_s23 = scalar_select %p1673_p6, 1, 0 }
  0x10   : > { %p1678_p8 = pnand %p1256_p5, %p154_p7  ;;  %s1597_s25 = smov [#allocation6]  }
  0x11   : > { %s172_s26 = sshll.u32 %s1597_s25, 4  ;;  %s39_s28 = sadd.s32 1, %s1591_s16  ;;  %s173_s26 = int_to_ptr.vmem [resolvable:$true] %s172_s26 }
  0x12   : > { %s2069_s24 = scalar_select %p1678_p8, 1, 0 }
  0x13   : > { %p1382_p9 = pneg %p1678_p8  ;;  %s1451_s4 = scalar_lea.hbm %s2058_s1, 8192 }
  0x14   : > { %p1452_p12 = scmp.ne.s32.totalorder %s2058_s1, %s1451_s4  ;;  %p1458_p5 = scmp.lt.u32.totalorder %s1451_s4, %s2058_s1 }
  0x15   : > { %p1687_p11 = pnand %p1382_p9, %p1658_p1 }
  0x17   : > { %p1453_p13 = pneg %p1687_p11 }
  0x19   : > { %p1454_p0 = pnand %p1453_p13, %p1452_p12 }
  0x1b   : > { %p1455_p3 = pneg %p1454_p0 }
  0x1d   : > { %p1460_p7 = pnand %p1458_p5, %p1455_p3 }
  0x1f   : > { %1463 = shalt.err (!%p1460_p7)
}
  0x20   : > { %s1464_s9 = scalar_lea.vmem %s173_s26, 8192  ;;  %p1472_p1 = scmp.lt.s32.totalorder %s173_s26, %s173_s26 }
  0x21   : > { %p1465_p9 = scmp.ne.s32.totalorder %s173_s26, %s1464_s9  ;;  %p1473_p4 = scmp.lt.s32.totalorder %s1464_s9, %s1464_s9 }
  0x23   : > { %p1467_p10 = pnand %p1465_p9, %p1453_p13  ;;  %p1474_p8 = por %p1473_p4, %p1472_p1 }
  0x25   : > { %p1468_p6 = pneg %p1467_p10 }
  0x27   : > { %p1475_p2 = pnand %p1474_p8, %p1468_p6 }
  0x29   : > { %1478 = shalt.err (!%p1475_p2)
}
  0x2a   : > { %s1598_s10 = smov 256   ;;  %s1599_s11 = smov 16  }
  0x2b   : > { %1385 = dma.hbm_to_vmem [thread:$0]  (!%p1687_p11), %s2058_s1, 8192, %s173_s26, [#allocation7], %s1598_s10, %s1598_s10, %s1599_s11  }
  0x2c   : > { %p41_p1 = scmp.ge.s32.totalorder %s39_s28, 2  ;;  %s48_s25 = sadd.s32 1, %s1583_s14 }
  0x2d   : > { %p55_p2 = scmp.ne.s32.totalorder %s1583_s14, %s1579_s13  ;;  %p56_p4 = scmp.eq.s32.totalorder %s1595_s17, 0 }
  0x2e   : > { %s2086_s28 = smov (%p41_p1, %s39_s28), 0  ;;  %p2072_p8 = scmp.ne.s32.totalorder %s2066_s21, 0 }
  0x2f   : > { %p1717_p6 = por %p56_p4, %p55_p2  ;;  %s43_s30 = ssub.s32 %s1591_s16, %s2086_s28 }
  0x30   : > { %p1723_p10 = por %p2072_p8, %p55_p2  ;;  %p1395_p12 = scmp.lt.s32.totalorder %s1595_s17, 2 }
  0x31   : > { %p46_p11 = scmp.eq.s32.totalorder %s43_s30, 0  ;;  %s194_s26 = sand.u32 1, %s1583_s14  }
  0x32   : > { %s1260_s4 = sshll.u32 %s194_s26, 9  ;;  %s1275_s6 = sshll.u32 %s1591_s16, 13 }
  0x33   : > { %s1732_s5 = scalar_select %p46_p11, %s1583_s14, %s48_s25  }
  0x34   : > { %s1738_s9 = scalar_lea.hbm %s2057_s0, %s1275_s6  ;;  %s198_s21 = scalar_lea.vmem [#allocation3], %s1260_s4 }
  0x35   : > { %s208_s18 = sshll.u32 %s198_s21, 4  ;;  %p1744_p13 = pnand %p1395_p12, %p1717_p6  ;;  %s1740_s18 = int_to_ptr.vmem [resolvable:$true] %s208_s18 }
  0x36   : > { %s1748_s25 = scalar_lea.sflag [#allocation4], %s194_s26  ;;  %s1479_s30 = scalar_lea.hbm %s1738_s9, 8192 }
  0x37   : > { %p1480_p0 = scmp.ne.s32.totalorder %s1738_s9, %s1479_s30  ;;  %p1481_p3 = pneg %p1744_p13 }
  0x38   : > { %s1484_s29 = scalar_lea.hbm %s2057_s0, 16384  ;;  %p1485_p9 = scmp.lt.u32.totalorder %s1738_s9, %s2057_s0 }
  0x39   : > { %p1482_p5 = pnand %p1481_p3, %p1480_p0  ;;  %p1486_p1 = scmp.lt.u32.totalorder %s1484_s29, %s1479_s30 }
  0x3a   : > { %p1488_p4 = scmp.lt.u32.totalorder %s1479_s30, %s1738_s9 }
  0x3b   : > { %p1483_p7 = pneg %p1482_p5  ;;  %p1487_p2 = por %p1486_p1, %p1485_p9 }
  0x3d   : > { %p1489_p6 = por %p1488_p4, %p1487_p2 }
  0x3f   : > { %p1490_p8 = pnand %p1489_p6, %p1483_p7 }
  0x41   : > { %1493 = shalt.err (!%p1490_p8)
}
  0x42   : > { %s1494_s26 = scalar_lea.vmem %s1740_s18, 8192  ;;  %s1600_s21 = smov [#allocation3]  }
  0x43   : > { %p1495_p12 = scmp.ne.s32.totalorder %s1740_s18, %s1494_s26  ;;  %s1499_s4 = sshll.u32 %s1600_s21, 4  ;;  %s1500_s4 = int_to_ptr.vmem [resolvable:$false] %s1499_s4 }
  0x44   : > { %s1501_s6 = scalar_lea.vmem %s1500_s4, 16384  ;;  %p1502_p5 = scmp.lt.s32.totalorder %s1740_s18, %s1500_s4 }
  0x45   : > { %p1497_p11 = pnand %p1495_p12, %p1481_p3  ;;  %p1503_p9 = scmp.lt.s32.totalorder %s1501_s6, %s1494_s26 }
  0x47   : > { %p1498_p0 = pneg %p1497_p11  ;;  %p1504_p1 = por %p1503_p9, %p1502_p5 }
  0x49   : > { %p1505_p2 = pnand %p1504_p1, %p1498_p0 }
  0x4b   : > { %1508 = shalt.err (!%p1505_p2)
}
  0x4c   : > { %1389 = dma.hbm_to_vmem [thread:$0]  (!%p1744_p13), %s1738_s9, 8192, %s1740_s18, %s1748_s25, %s1598_s10, %s1598_s10, %s1599_s11  }
  0x4d   : > { %p2075_p3 = scmp.ne.s32.totalorder %s2069_s24, 0 }
  0x4e   : > { %s1782_s30 = sand.u32 (!%p2075_p3), 1, %s1579_s13   ;;  %p2076_p7 = scmp.ne.s32.totalorder (!%p2075_p3), %s2067_s22, 0 }
  0x4f   : > { %220 = sbr.rel (%p2075_p3) target bundleno = 447 (0x1bf), region = 32  ;;  %s1265_s29 = sshll.u32 (!%p2075_p3), %s1782_s30, 9 }
  0x50   : > { %s223_s7 = scalar_lea.sflag (!%p2075_p3), [#allocation4], %s1782_s30  ;;  %s1788_s19 = scalar_lea.vmem (!%p2075_p3), [#allocation3], %s1265_s29 }
  0x56   : > { %1562 = dma.done.wait (%p2076_p7), %s223_s7, 8192  }
  0x57   : > { %1564 = vsyncadd (%p2076_p7), %s223_s7, 4294959104  ;;  %p2077_p13 = scmp.ne.s32.totalorder %s2065_s20, 0 }
  0x59   : > { %1566 = dma.done.wait (%p2077_p13), [#allocation7], 8192  }
  0x5a   : > { %1568 = vsyncadd (%p2077_p13), [#allocation7], 4294959104  ;;  %v465_v0 = vld [vmem:[#allocation6 + $0x8] sm:$0xff]  ;;  %v467_v1 = vld [vmem:[#allocation6 + $0x18] sm:$0xff]  ;;  %s1875_s24 = scalar_lea.vmem [#allocation8], %s1265_s29  ;;  %s1277_s10 = sshll.u32 %s1587_s15, 13 }
  0x5b   : > { %v464_v2 = vld [vmem:[#allocation6] sm:$0xff]  ;;  %v1278_v3 = vpack.c.bf16 %v467_v1, %v465_v0  ;;  %v466_v4 = vld [vmem:[#allocation6 + $0x10] sm:$0xff]  ;;  %v469_v5 = vld [vmem:[#allocation6 + $0x28] sm:$0xff]  ;;  %s1137_s11 = sshll.u32 %s1875_s24, 4  ;;  %s2000_s18 = scalar_lea.hbm %s2060_s3, %s1277_s10  ;;  %s2002_s11 = int_to_ptr.vmem [resolvable:$true] %s1137_s11 }
  0x5c   : > { %v471_v6 = vld [vmem:[#allocation6 + $0x38] sm:$0xff]  ;;  %v1280_v7 = vpack.c.bf16 %v466_v4, %v464_v2  ;;  %v468_v9 = vld [vmem:[#allocation6 + $0x20] sm:$0xff]  ;;  %v470_v10 = vld [vmem:[#allocation6 + $0x30] sm:$0xff]  ;;  %s1121_s25 = scalar_lea.sflag [#allocation5], %s1782_s30  ;;  %s1509_s8 = scalar_lea.vmem %s2002_s11, 8192 }
  0x5d   : > { %v1282_v8 = vpack.c.bf16 %v471_v6, %v469_v5  ;;  %v473_v11 = vld [vmem:[#allocation6 + $0x48] sm:$0xff]  ;;  %1279 = vmatprep.subr.bf16.mxu0 %v1278_v3  ;;  %1342 = vmatprep.subr.bf16.mxu1 %v1278_v3  ;;  %v475_v12 = vld [vmem:[#allocation6 + $0x58] sm:$0xff]  ;;  %v1284_v13 = vpack.c.bf16 %v470_v10, %v468_v9  ;;  %v472_v15 = vld [vmem:[#allocation6 + $0x40] sm:$0xff]  ;;  %p1510_p4 = scmp.ne.s32.totalorder %s2002_s11, %s1509_s8  ;;  %s1601_s26 = smov [#allocation8]  }
  0x5e   : > { %1281 = vmatpush1.bf16.msra.mxu0 %v1280_v7  ;;  %1358 = vmatpush1.bf16.msra.mxu1 %v1280_v7  ;;  %v1286_v14 = vpack.c.bf16 %v475_v12, %v473_v11  ;;  %v474_v16 = vld [vmem:[#allocation6 + $0x50] sm:$0xff]  ;;  %v477_v17 = vld [vmem:[#allocation6 + $0x68] sm:$0xff]  ;;  %v479_v18 = vld [vmem:[#allocation6 + $0x78] sm:$0xff]  ;;  %s1513_s21 = sshll.u32 %s1601_s26, 4  ;;  %s1514_s21 = int_to_ptr.vmem [resolvable:$false] %s1513_s21 }
  0x5f   : > { %1283 = vmatprep.subr.bf16.mxu0 %v1282_v8  ;;  %1343 = vmatprep.subr.bf16.mxu1 %v1282_v8  ;;  %v1288_v19 = vpack.c.bf16 %v474_v16, %v472_v15  ;;  %v1290_v20 = vpack.c.bf16 %v479_v18, %v477_v17  ;;  %v476_v21 = vld [vmem:[#allocation6 + $0x60] sm:$0xff]  ;;  %v478_v22 = vld [vmem:[#allocation6 + $0x70] sm:$0xff]  ;;  %v481_v23 = vld [vmem:[#allocation6 + $0x88] sm:$0xff]  ;;  %p1511_p6 = pnand %p1510_p4, %p1723_p10  ;;  %s1515_s4 = scalar_lea.vmem %s1514_s21, 16384 }
  0x60   : > { %v483_v24 = vld [vmem:[#allocation6 + $0x98] sm:$0xff]  ;;  %v1292_v25 = vpack.c.bf16 %v478_v22, %v476_v21  ;;  %v480_v27 = vld [vmem:[#allocation6 + $0x80] sm:$0xff]  ;;  %v482_v28 = vld [vmem:[#allocation6 + $0x90] sm:$0xff]  ;;  %p1516_p12 = scmp.lt.s32.totalorder %s2002_s11, %s1514_s21  ;;  %p1517_p11 = scmp.lt.s32.totalorder %s1515_s4, %s1509_s8 }
  0x61   : > { %v1294_v26 = vpack.c.bf16 %v483_v24, %v481_v23  ;;  %v485_v29 = vld [vmem:[#allocation6 + $0xa8] sm:$0xff]  ;;  %v487_v30 = vld [vmem:[#allocation6 + $0xb8] sm:$0xff]  ;;  %v1296_v31 = vpack.c.bf16 %v482_v28, %v480_v27  ;;  %v484_v33 = vld [vmem:[#allocation6 + $0xa0] sm:$0xff]  ;;  %p1512_p8 = pneg %p1511_p6 }
  0x62   : > { %1285 = vmatpush1.bf16.msra.mxu0 %v1284_v13  ;;  %1359 = vmatpush1.bf16.msra.mxu1 %v1284_v13  ;;  %v1298_v32 = vpack.c.bf16 %v487_v30, %v485_v29  ;;  %v486_v34 = vld [vmem:[#allocation6 + $0xb0] sm:$0xff]  ;;  %v489_v35 = vld [vmem:[#allocation6 + $0xc8] sm:$0xff]  ;;  %v491_v36 = vld [vmem:[#allocation6 + $0xd8] sm:$0xff]  ;;  %p1518_p0 = por %p1517_p11, %p1516_p12 }
  0x63   : > { %1287 = vmatprep.subr.bf16.mxu0 %v1286_v14  ;;  %1344 = vmatprep.subr.bf16.mxu1 %v1286_v14  ;;  %v1300_v37 = vpack.c.bf16 %v486_v34, %v484_v33  ;;  %v488_v38 = vld [vmem:[#allocation6 + $0xc0] sm:$0xff]  ;;  %v1302_v39 = vpack.c.bf16 %v491_v36, %v489_v35  ;;  %v490_v40 = vld [vmem:[#allocation6 + $0xd0] sm:$0xff]  ;;  %v401_v41 = vld [vmem:[%s1788_s19 + $0x8] sm:$0xff] }
  0x64   : > { %v433_v42 = vld [vmem:[%s1788_s19 + $0x108] sm:$0xff]  ;;  %v495_v44 = vld [vmem:[#allocation6 + $0xf8] sm:$0xff]  ;;  %592 = vmatprep.mubr.f32.mxu0 %v401_v41  ;;  %v1304_v45 = vpack.c.bf16 %v490_v40, %v488_v38  ;;  %v492_v47 = vld [vmem:[#allocation6 + $0xe0] sm:$0xff]  ;;  %p1519_p5 = pnand %p1518_p0, %p1512_p8 }
  0x65   : > { %v493_v43 = vld [vmem:[#allocation6 + $0xe8] sm:$0xff]  ;;  %688 = vmatprep.mubr.f32.mxu1 %v433_v42  ;;  %v494_v48 = vld [vmem:[#allocation6 + $0xf0] sm:$0xff]  ;;  %v499_v50 = vld [vmem:[#allocation6 + $0x118] sm:$0xff] }
  0x66   : > { %1289 = vmatpush1.bf16.msra.mxu0 %v1288_v19  ;;  %1360 = vmatpush1.bf16.msra.mxu1 %v1288_v19  ;;  %v1306_v46 = vpack.c.bf16 %v495_v44, %v493_v43  ;;  %v497_v49 = vld [vmem:[#allocation6 + $0x108] sm:$0xff]  ;;  %v1308_v51 = vpack.c.bf16 %v494_v48, %v492_v47  ;;  %v496_v53 = vld [vmem:[#allocation6 + $0x100] sm:$0xff]  ;;  %v498_v54 = vld [vmem:[#allocation6 + $0x110] sm:$0xff] }
  0x67   : > { %1291 = vmatprep.subr.bf16.mxu0 %v1290_v20  ;;  %1345 = vmatprep.subr.bf16.mxu1 %v1290_v20  ;;  %v1310_v52 = vpack.c.bf16 %v499_v50, %v497_v49  ;;  %v501_v55 = vld [vmem:[#allocation6 + $0x128] sm:$0xff]  ;;  %v503_v56 = vld [vmem:[#allocation6 + $0x138] sm:$0xff]  ;;  %v1312_v57 = vpack.c.bf16 %v498_v54, %v496_v53  ;;  %v500_v59 = vld [vmem:[#allocation6 + $0x120] sm:$0xff] }
  0x68   : > { %v1314_v58 = vpack.c.bf16 %v503_v56, %v501_v55  ;;  %v502_v60 = vld [vmem:[#allocation6 + $0x130] sm:$0xff]  ;;  %v505_v61 = vld [vmem:[#allocation6 + $0x148] sm:$0xff]  ;;  %v507_v62 = vld [vmem:[#allocation6 + $0x158] sm:$0xff] }
  0x69   : > { %v1316_v63 = vpack.c.bf16 %v502_v60, %v500_v59  ;;  %v1318_v0 = vpack.c.bf16 %v507_v62, %v505_v61  ;;  %v504_v1 = vld [vmem:[#allocation6 + $0x140] sm:$0xff]  ;;  %v506_v2 = vld [vmem:[#allocation6 + $0x150] sm:$0xff]  ;;  %v509_v3 = vld [vmem:[#allocation6 + $0x168] sm:$0xff] }
  0x6a   : > { %1293 = vmatpush1.bf16.msra.mxu0 %v1292_v25  ;;  %1361 = vmatpush1.bf16.msra.mxu1 %v1292_v25  ;;  %v511_v4 = vld [vmem:[#allocation6 + $0x178] sm:$0xff]  ;;  %v1320_v5 = vpack.c.bf16 %v506_v2, %v504_v1  ;;  %v508_v7 = vld [vmem:[#allocation6 + $0x160] sm:$0xff]  ;;  %v510_v8 = vld [vmem:[#allocation6 + $0x170] sm:$0xff] }
  0x6b   : > { %1295 = vmatprep.subr.bf16.mxu0 %v1294_v26  ;;  %1346 = vmatprep.subr.bf16.mxu1 %v1294_v26  ;;  %v1322_v6 = vpack.c.bf16 %v511_v4, %v509_v3  ;;  %v513_v9 = vld [vmem:[#allocation6 + $0x188] sm:$0xff]  ;;  %v515_v10 = vld [vmem:[#allocation6 + $0x198] sm:$0xff]  ;;  %v1324_v11 = vpack.c.bf16 %v510_v8, %v508_v7  ;;  %v512_v13 = vld [vmem:[#allocation6 + $0x180] sm:$0xff] }
  0x6c   : > { %v1326_v12 = vpack.c.bf16 %v515_v10, %v513_v9  ;;  %v514_v14 = vld [vmem:[#allocation6 + $0x190] sm:$0xff]  ;;  %v517_v15 = vld [vmem:[#allocation6 + $0x1a8] sm:$0xff]  ;;  %v519_v16 = vld [vmem:[#allocation6 + $0x1b8] sm:$0xff] }
  0x6d   : > { %v1328_v17 = vpack.c.bf16 %v514_v14, %v512_v13  ;;  %v1330_v18 = vpack.c.bf16 %v519_v16, %v517_v15  ;;  %v516_v19 = vld [vmem:[#allocation6 + $0x1a0] sm:$0xff]  ;;  %v518_v20 = vld [vmem:[#allocation6 + $0x1b0] sm:$0xff]  ;;  %v521_v21 = vld [vmem:[#allocation6 + $0x1c8] sm:$0xff] }
  0x6e   : > { %1297 = vmatpush1.bf16.msra.mxu0 %v1296_v31  ;;  %1362 = vmatpush1.bf16.msra.mxu1 %v1296_v31  ;;  %v523_v22 = vld [vmem:[#allocation6 + $0x1d8] sm:$0xff]  ;;  %v1332_v23 = vpack.c.bf16 %v518_v20, %v516_v19  ;;  %v520_v25 = vld [vmem:[#allocation6 + $0x1c0] sm:$0xff]  ;;  %v522_v26 = vld [vmem:[#allocation6 + $0x1d0] sm:$0xff] }
  0x6f   : > { %1299 = vmatprep.subr.bf16.mxu0 %v1298_v32  ;;  %1347 = vmatprep.subr.bf16.mxu1 %v1298_v32  ;;  %v1334_v24 = vpack.c.bf16 %v523_v22, %v521_v21  ;;  %v525_v27 = vld [vmem:[#allocation6 + $0x1e8] sm:$0xff]  ;;  %v527_v28 = vld [vmem:[#allocation6 + $0x1f8] sm:$0xff]  ;;  %v1336_v29 = vpack.c.bf16 %v522_v26, %v520_v25  ;;  %v524_v31 = vld [vmem:[#allocation6 + $0x1e0] sm:$0xff] }
  0x70   : > { %v1338_v30 = vpack.c.bf16 %v527_v28, %v525_v27  ;;  %v526_v32 = vld [vmem:[#allocation6 + $0x1f0] sm:$0xff]  ;;  %v400_v34 = vld [vmem:[%s1788_s19] sm:$0xff]  ;;  %v403_v36 = vld [vmem:[%s1788_s19 + $0x18] sm:$0xff] }
  0x71   : > { %v1340_v33 = vpack.c.bf16 %v526_v32, %v524_v31  ;;  %v432_v35 = vld [vmem:[%s1788_s19 + $0x100] sm:$0xff]  ;;  %v402_v38 = vld [vmem:[%s1788_s19 + $0x10] sm:$0xff]  ;;  %v405_v40 = vld [vmem:[%s1788_s19 + $0x28] sm:$0xff]  ;;  %v982_v32 = vlaneseq }
  0x72   : > { %1301 = vmatpush1.bf16.msra.mxu0 %v1300_v37  ;;  %1363 = vmatpush1.bf16.msra.mxu1 %v1300_v37  ;;  %v435_v37 = vld [vmem:[%s1788_s19 + $0x118] sm:$0xff]  ;;  %v437_v41 = vld [vmem:[%s1788_s19 + $0x128] sm:$0xff]  ;;  %v404_v42 = vld [vmem:[%s1788_s19 + $0x20] sm:$0xff] }
  0x73   : > { %1303 = vmatprep.subr.bf16.mxu0 %v1302_v39  ;;  %1348 = vmatprep.subr.bf16.mxu1 %v1302_v39  ;;  %v434_v39 = vld [vmem:[%s1788_s19 + $0x110] sm:$0xff]  ;;  %v436_v43 = vld [vmem:[%s1788_s19 + $0x120] sm:$0xff]  ;;  %v407_v44 = vld [vmem:[%s1788_s19 + $0x38] sm:$0xff] }
  0x74   : > { %v438_v47 = vld [vmem:[%s1788_s19 + $0x130] sm:$0xff]  ;;  %v409_v48 = vld [vmem:[%s1788_s19 + $0x48] sm:$0xff]  ;;  %v408_v50 = vld [vmem:[%s1788_s19 + $0x40] sm:$0xff] }
  0x75   : > { %v441_v49 = vld [vmem:[%s1788_s19 + $0x148] sm:$0xff]  ;;  %v443_v53 = vld [vmem:[%s1788_s19 + $0x158] sm:$0xff]  ;;  %v410_v54 = vld [vmem:[%s1788_s19 + $0x50] sm:$0xff] }
  0x76   : > { %1305 = vmatpush1.bf16.msra.mxu0 %v1304_v45  ;;  %1364 = vmatpush1.bf16.msra.mxu1 %v1304_v45  ;;  %v439_v45 = vld [vmem:[%s1788_s19 + $0x138] sm:$0xff]  ;;  %v442_v55 = vld [vmem:[%s1788_s19 + $0x150] sm:$0xff]  ;;  %v413_v56 = vld [vmem:[%s1788_s19 + $0x68] sm:$0xff] }
  0x77   : > { %1307 = vmatprep.subr.bf16.mxu0 %v1306_v46  ;;  %1349 = vmatprep.subr.bf16.mxu1 %v1306_v46  ;;  %v406_v46 = vld [vmem:[%s1788_s19 + $0x30] sm:$0xff]  ;;  %v444_v59 = vld [vmem:[%s1788_s19 + $0x160] sm:$0xff]  ;;  %v415_v60 = vld [vmem:[%s1788_s19 + $0x78] sm:$0xff] }
  0x78   : > { %v447_v61 = vld [vmem:[%s1788_s19 + $0x178] sm:$0xff]  ;;  %v414_v62 = vld [vmem:[%s1788_s19 + $0x70] sm:$0xff]  ;;  %v449_v1 = vld [vmem:[%s1788_s19 + $0x188] sm:$0xff] }
  0x79   : > { %v416_v2 = vld [vmem:[%s1788_s19 + $0x80] sm:$0xff]  ;;  %v419_v4 = vld [vmem:[%s1788_s19 + $0x98] sm:$0xff]  ;;  %v450_v7 = vld [vmem:[%s1788_s19 + $0x190] sm:$0xff] }
  0x7a   : > { %1309 = vmatpush1.bf16.msra.mxu0 %v1308_v51  ;;  %1365 = vmatpush1.bf16.msra.mxu1 %v1308_v51  ;;  %v440_v51 = vld [vmem:[%s1788_s19 + $0x140] sm:$0xff]  ;;  %v421_v8 = vld [vmem:[%s1788_s19 + $0xa8] sm:$0xff]  ;;  %v455_v13 = vld [vmem:[%s1788_s19 + $0x1b8] sm:$0xff] }
  0x7b   : > { %1311 = vmatprep.subr.bf16.mxu0 %v1310_v52  ;;  %1350 = vmatprep.subr.bf16.mxu1 %v1310_v52  ;;  %v411_v52 = vld [vmem:[%s1788_s19 + $0x58] sm:$0xff]  ;;  %v448_v3 = vld [vmem:[%s1788_s19 + $0x180] sm:$0xff]  ;;  %v453_v9 = vld [vmem:[%s1788_s19 + $0x1a8] sm:$0xff] }
  0x7c   : > { %v420_v10 = vld [vmem:[%s1788_s19 + $0xa0] sm:$0xff]  ;;  %v422_v14 = vld [vmem:[%s1788_s19 + $0xb0] sm:$0xff]  ;;  %v425_v16 = vld [vmem:[%s1788_s19 + $0xc8] sm:$0xff] }
  0x7d   : > { %v454_v15 = vld [vmem:[%s1788_s19 + $0x1b0] sm:$0xff]  ;;  %v456_v19 = vld [vmem:[%s1788_s19 + $0x1c0] sm:$0xff]  ;;  %v427_v20 = vld [vmem:[%s1788_s19 + $0xd8] sm:$0xff] }
  0x7e   : > { %1313 = vmatpush1.bf16.msra.mxu0 %v1312_v57  ;;  %1366 = vmatpush1.bf16.msra.mxu1 %v1312_v57  ;;  %v445_v57 = vld [vmem:[%s1788_s19 + $0x168] sm:$0xff]  ;;  %v459_v21 = vld [vmem:[%s1788_s19 + $0x1d8] sm:$0xff]  ;;  %v426_v22 = vld [vmem:[%s1788_s19 + $0xd0] sm:$0xff] }
  0x7f   : > { %1315 = vmatprep.subr.bf16.mxu0 %v1314_v58  ;;  %1351 = vmatprep.subr.bf16.mxu1 %v1314_v58  ;;  %v412_v58 = vld [vmem:[%s1788_s19 + $0x60] sm:$0xff]  ;;  %v461_v25 = vld [vmem:[%s1788_s19 + $0x1e8] sm:$0xff]  ;;  %v431_v28 = vld [vmem:[%s1788_s19 + $0xf8] sm:$0xff] }
  0x80   : > { %v428_v26 = vld [vmem:[%s1788_s19 + $0xe0] sm:$0xff]  ;;  %v462_v31 = vld [vmem:[%s1788_s19 + $0x1f0] sm:$0xff] }
  0x81   : > { %v460_v27 = vld [vmem:[%s1788_s19 + $0x1e0] sm:$0xff] }
  0x82   : > { %1317 = vmatpush1.bf16.msra.mxu0 %v1316_v63  ;;  %1367 = vmatpush1.bf16.msra.mxu1 %v1316_v63  ;;  %v446_v63 = vld [vmem:[%s1788_s19 + $0x170] sm:$0xff] }
  0x83   : > { %1319 = vmatprep.subr.bf16.mxu0 %v1318_v0  ;;  %1352 = vmatprep.subr.bf16.mxu1 %v1318_v0  ;;  %v417_v0 = vld [vmem:[%s1788_s19 + $0x88] sm:$0xff] }
  0x86   : > { %1321 = vmatpush1.bf16.msra.mxu0 %v1320_v5  ;;  %1368 = vmatpush1.bf16.msra.mxu1 %v1320_v5  ;;  %v451_v5 = vld [vmem:[%s1788_s19 + $0x198] sm:$0xff] }
  0x87   : > { %1323 = vmatprep.subr.bf16.mxu0 %v1322_v6  ;;  %1353 = vmatprep.subr.bf16.mxu1 %v1322_v6  ;;  %v418_v6 = vld [vmem:[%s1788_s19 + $0x90] sm:$0xff] }
  0x8a   : > { %1325 = vmatpush1.bf16.msra.mxu0 %v1324_v11  ;;  %1369 = vmatpush1.bf16.msra.mxu1 %v1324_v11  ;;  %v452_v11 = vld [vmem:[%s1788_s19 + $0x1a0] sm:$0xff] }
  0x8b   : > { %1327 = vmatprep.subr.bf16.mxu0 %v1326_v12  ;;  %1354 = vmatprep.subr.bf16.mxu1 %v1326_v12  ;;  %v423_v12 = vld [vmem:[%s1788_s19 + $0xb8] sm:$0xff] }
  0x8e   : > { %1329 = vmatpush1.bf16.msra.mxu0 %v1328_v17  ;;  %1370 = vmatpush1.bf16.msra.mxu1 %v1328_v17  ;;  %v457_v17 = vld [vmem:[%s1788_s19 + $0x1c8] sm:$0xff] }
  0x8f   : > { %1331 = vmatprep.subr.bf16.mxu0 %v1330_v18  ;;  %1355 = vmatprep.subr.bf16.mxu1 %v1330_v18  ;;  %v424_v18 = vld [vmem:[%s1788_s19 + $0xc0] sm:$0xff] }
  0x92   : > { %1333 = vmatpush1.bf16.msra.mxu0 %v1332_v23  ;;  %1371 = vmatpush1.bf16.msra.mxu1 %v1332_v23  ;;  %v458_v23 = vld [vmem:[%s1788_s19 + $0x1d0] sm:$0xff] }
  0x93   : > { %1335 = vmatprep.subr.bf16.mxu0 %v1334_v24  ;;  %1356 = vmatprep.subr.bf16.mxu1 %v1334_v24  ;;  %v429_v24 = vld [vmem:[%s1788_s19 + $0xe8] sm:$0xff] }
  0x96   : > { %1337 = vmatpush1.bf16.msra.mxu0 %v1336_v29  ;;  %1372 = vmatpush1.bf16.msra.mxu1 %v1336_v29  ;;  %v463_v29 = vld [vmem:[%s1788_s19 + $0x1f8] sm:$0xff] }
  0x97   : > { %1339 = vmatprep.subr.bf16.mxu0 %v1338_v30  ;;  %1357 = vmatprep.subr.bf16.mxu1 %v1338_v30  ;;  %v430_v30 = vld [vmem:[%s1788_s19 + $0xf0] sm:$0xff] }
  0x9a   : > { %1341 = vmatpush1.bf16.msra.mxu0 %v1340_v33  ;;  %1373 = vmatpush1.bf16.msra.mxu1 %v1340_v33  ;;  %v983_v33 = vshrl.u32 %v982_v32, 7 }
  0x9d   : > { %593 = vmatmul.mubr.f32.vlgmr.msra.gmra.mrb[0].mxu0 %v400_v34  ;;  %689 = vmatmul.mubr.f32.vlgmr.msra.gmra.mrb[0].mxu1 %v432_v35  ;;  %v984_v34 = vsub.s32 0, %v983_v33  ;;  %v980_v35 = vld [vmem:[%s2059_s2] sm:$0x3] }
  0x9e   : > { %598 = vmatprep.mubr.f32.mxu0 %v403_v36  ;;  %694 = vmatprep.mubr.f32.mxu1 %v435_v37  ;;  %v988_v36 = vsub.s32 1, %v983_v33 }
  0x9f   : > { %v1865_v37 = vrot.slane %v980_v35, %v984_v34 }
  0xa1   : > { %599 = vmatmul.mubr.f32.gmra.mrb[2].mxu0 %v402_v38  ;;  %695 = vmatmul.mubr.f32.gmra.mrb[2].mxu1 %v434_v39  ;;  %v1867_v38 = vrot.slane %v980_v35, %v988_v36 }
  0xa2   : > { %604 = vmatprep.mubr.f32.mxu0 %v405_v40  ;;  %700 = vmatprep.mubr.f32.mxu1 %v437_v41 }
  0xa5   : > { %605 = vmatmul.mubr.f32.gmra.mrb[4].mxu0 %v404_v42  ;;  %701 = vmatmul.mubr.f32.gmra.mrb[4].mxu1 %v436_v43 }
  0xa6   : > { %610 = vmatprep.mubr.f32.mxu0 %v407_v44  ;;  %706 = vmatprep.mubr.f32.mxu1 %v439_v45 }
  0xa9   : > { %611 = vmatmul.mubr.f32.gmra.mrb[6].mxu0 %v406_v46  ;;  %707 = vmatmul.mubr.f32.gmra.mrb[6].mxu1 %v438_v47 }
  0xaa   : > { %616 = vmatprep.mubr.f32.mxu0 %v409_v48  ;;  %712 = vmatprep.mubr.f32.mxu1 %v441_v49 }
  0xad   : > { %617 = vmatmul.mubr.f32.gmra.mrb[8].mxu0 %v408_v50  ;;  %713 = vmatmul.mubr.f32.gmra.mrb[8].mxu1 %v440_v51 }
  0xae   : > { %622 = vmatprep.mubr.f32.mxu0 %v411_v52  ;;  %718 = vmatprep.mubr.f32.mxu1 %v443_v53 }
  0xb1   : > { %623 = vmatmul.mubr.f32.gmra.mrb[10].mxu0 %v410_v54  ;;  %719 = vmatmul.mubr.f32.gmra.mrb[10].mxu1 %v442_v55 }
  0xb2   : > { %628 = vmatprep.mubr.f32.mxu0 %v413_v56  ;;  %724 = vmatprep.mubr.f32.mxu1 %v445_v57 }
  0xb5   : > { %629 = vmatmul.mubr.f32.gmra.mrb[12].mxu0 %v412_v58  ;;  %725 = vmatmul.mubr.f32.gmra.mrb[12].mxu1 %v444_v59 }
  0xb6   : > { %634 = vmatprep.mubr.f32.mxu0 %v415_v60  ;;  %730 = vmatprep.mubr.f32.mxu1 %v447_v61 }
  0xb9   : > { %635 = vmatmul.mubr.f32.gmra.mrb[14].mxu0 %v414_v62  ;;  %731 = vmatmul.mubr.f32.gmra.mrb[14].mxu1 %v446_v63 }
  0xba   : > { %640 = vmatprep.mubr.f32.mxu0 %v417_v0  ;;  %736 = vmatprep.mubr.f32.mxu1 %v449_v1 }
  0xbd   : > { %641 = vmatmul.mubr.f32.gmra.mrb[16].mxu0 %v416_v2  ;;  %737 = vmatmul.mubr.f32.gmra.mrb[16].mxu1 %v448_v3 }
  0xbe   : > { %646 = vmatprep.mubr.f32.mxu0 %v419_v4  ;;  %742 = vmatprep.mubr.f32.mxu1 %v451_v5 }
  0xc1   : > { %647 = vmatmul.mubr.f32.gmra.mrb[18].mxu0 %v418_v6  ;;  %743 = vmatmul.mubr.f32.gmra.mrb[18].mxu1 %v450_v7 }
  0xc2   : > { %652 = vmatprep.mubr.f32.mxu0 %v421_v8  ;;  %748 = vmatprep.mubr.f32.mxu1 %v453_v9 }
  0xc5   : > { %653 = vmatmul.mubr.f32.gmra.mrb[20].mxu0 %v420_v10  ;;  %749 = vmatmul.mubr.f32.gmra.mrb[20].mxu1 %v452_v11 }
  0xc6   : > { %658 = vmatprep.mubr.f32.mxu0 %v423_v12  ;;  %754 = vmatprep.mubr.f32.mxu1 %v455_v13 }
  0xc9   : > { %659 = vmatmul.mubr.f32.gmra.mrb[22].mxu0 %v422_v14  ;;  %755 = vmatmul.mubr.f32.gmra.mrb[22].mxu1 %v454_v15 }
  0xca   : > { %664 = vmatprep.mubr.f32.mxu0 %v425_v16  ;;  %760 = vmatprep.mubr.f32.mxu1 %v457_v17 }
  0xcd   : > { %665 = vmatmul.mubr.f32.gmra.mrb[24].mxu0 %v424_v18  ;;  %761 = vmatmul.mubr.f32.gmra.mrb[24].mxu1 %v456_v19 }
  0xce   : > { %670 = vmatprep.mubr.f32.mxu0 %v427_v20  ;;  %766 = vmatprep.mubr.f32.mxu1 %v459_v21 }
  0xd1   : > { %671 = vmatmul.mubr.f32.gmra.mrb[26].mxu0 %v426_v22  ;;  %767 = vmatmul.mubr.f32.gmra.mrb[26].mxu1 %v458_v23 }
  0xd2   : > { %676 = vmatprep.mubr.f32.mxu0 %v429_v24  ;;  %772 = vmatprep.mubr.f32.mxu1 %v461_v25 }
  0xd5   : > { %677 = vmatmul.mubr.f32.gmra.mrb[28].mxu0 %v428_v26  ;;  %773 = vmatmul.mubr.f32.gmra.mrb[28].mxu1 %v460_v27 }
  0xd6   : > { %682 = vmatprep.mubr.f32.mxu0 %v431_v28  ;;  %778 = vmatprep.mubr.f32.mxu1 %v463_v29 }
  0xd9   : > { %683 = vmatmul.mubr.f32.gmra.mrb[30].mxu0 %v430_v30  ;;  %779 = vmatmul.mubr.f32.gmra.mrb[30].mxu1 %v462_v31 }
 0x170   : > { %v594_v39 = vpop.f32.mrb[0].mxu0  ;;  %v690_v40 = vpop.f32.mrb[0].mxu1 }
 0x171   : > { %v992_v41 = vadd.f32 %v1865_v37, %v594_v39  ;;  %v1024_v42 = vadd.f32 %v1865_v37, %v690_v40  ;;  %v596_v43 = vpop.f32.mrb[1].mxu0  ;;  %v692_v44 = vpop.f32.mrb[1].mxu1 }
 0x172   : > { %v993_v45 = vadd.f32 %v1867_v38, %v596_v43  ;;  %v1025_v46 = vadd.f32 %v1867_v38, %v692_v44 }
 0x173   : > { %1056 = vst [vmem:[%s1875_s24] sm:$0xff] %v992_v41  ;;  %1088 = vst [vmem:[%s1875_s24 + $0x100] sm:$0xff] %v1024_v42 }
 0x174   : > { %1057 = vst [vmem:[%s1875_s24 + $0x8] sm:$0xff] %v993_v45  ;;  %1089 = vst [vmem:[%s1875_s24 + $0x108] sm:$0xff] %v1025_v46  ;;  %v600_v47 = vpop.f32.mrb[2].mxu0  ;;  %v696_v48 = vpop.f32.mrb[2].mxu1 }
 0x175   : > { %v994_v49 = vadd.f32 %v1865_v37, %v600_v47  ;;  %v1026_v50 = vadd.f32 %v1865_v37, %v696_v48  ;;  %v602_v51 = vpop.f32.mrb[3].mxu0  ;;  %v698_v52 = vpop.f32.mrb[3].mxu1 }
 0x176   : > { %v995_v53 = vadd.f32 %v1867_v38, %v602_v51  ;;  %v1027_v54 = vadd.f32 %v1867_v38, %v698_v52 }
 0x177   : > { %1058 = vst [vmem:[%s1875_s24 + $0x10] sm:$0xff] %v994_v49  ;;  %1090 = vst [vmem:[%s1875_s24 + $0x110] sm:$0xff] %v1026_v50 }
 0x178   : > { %1059 = vst [vmem:[%s1875_s24 + $0x18] sm:$0xff] %v995_v53  ;;  %1091 = vst [vmem:[%s1875_s24 + $0x118] sm:$0xff] %v1027_v54  ;;  %v606_v55 = vpop.f32.mrb[4].mxu0  ;;  %v702_v56 = vpop.f32.mrb[4].mxu1 }
 0x179   : > { %v996_v57 = vadd.f32 %v1865_v37, %v606_v55  ;;  %v1028_v58 = vadd.f32 %v1865_v37, %v702_v56  ;;  %v608_v59 = vpop.f32.mrb[5].mxu0  ;;  %v704_v60 = vpop.f32.mrb[5].mxu1 }
 0x17a   : > { %v997_v61 = vadd.f32 %v1867_v38, %v608_v59  ;;  %v1029_v62 = vadd.f32 %v1867_v38, %v704_v60 }
 0x17b   : > { %1060 = vst [vmem:[%s1875_s24 + $0x20] sm:$0xff] %v996_v57  ;;  %1092 = vst [vmem:[%s1875_s24 + $0x120] sm:$0xff] %v1028_v58 }
 0x17c   : > { %1061 = vst [vmem:[%s1875_s24 + $0x28] sm:$0xff] %v997_v61  ;;  %1093 = vst [vmem:[%s1875_s24 + $0x128] sm:$0xff] %v1029_v62  ;;  %v612_v63 = vpop.f32.mrb[6].mxu0  ;;  %v708_v0 = vpop.f32.mrb[6].mxu1 }
 0x17d   : > { %v998_v1 = vadd.f32 %v1865_v37, %v612_v63  ;;  %v1030_v2 = vadd.f32 %v1865_v37, %v708_v0  ;;  %v614_v3 = vpop.f32.mrb[7].mxu0  ;;  %v710_v4 = vpop.f32.mrb[7].mxu1 }
 0x17e   : > { %v999_v5 = vadd.f32 %v1867_v38, %v614_v3  ;;  %v1031_v6 = vadd.f32 %v1867_v38, %v710_v4 }
 0x17f   : > { %1062 = vst [vmem:[%s1875_s24 + $0x30] sm:$0xff] %v998_v1  ;;  %1094 = vst [vmem:[%s1875_s24 + $0x130] sm:$0xff] %v1030_v2 }
 0x180   : > { %1063 = vst [vmem:[%s1875_s24 + $0x38] sm:$0xff] %v999_v5  ;;  %1095 = vst [vmem:[%s1875_s24 + $0x138] sm:$0xff] %v1031_v6  ;;  %v618_v7 = vpop.f32.mrb[8].mxu0  ;;  %v714_v8 = vpop.f32.mrb[8].mxu1 }
 0x181   : > { %v1000_v9 = vadd.f32 %v1865_v37, %v618_v7  ;;  %v1032_v10 = vadd.f32 %v1865_v37, %v714_v8  ;;  %v620_v11 = vpop.f32.mrb[9].mxu0  ;;  %v716_v12 = vpop.f32.mrb[9].mxu1 }
 0x182   : > { %v1001_v13 = vadd.f32 %v1867_v38, %v620_v11  ;;  %v1033_v14 = vadd.f32 %v1867_v38, %v716_v12 }
 0x183   : > { %1064 = vst [vmem:[%s1875_s24 + $0x40] sm:$0xff] %v1000_v9  ;;  %1096 = vst [vmem:[%s1875_s24 + $0x140] sm:$0xff] %v1032_v10 }
 0x184   : > { %1065 = vst [vmem:[%s1875_s24 + $0x48] sm:$0xff] %v1001_v13  ;;  %1097 = vst [vmem:[%s1875_s24 + $0x148] sm:$0xff] %v1033_v14  ;;  %v624_v15 = vpop.f32.mrb[10].mxu0  ;;  %v720_v16 = vpop.f32.mrb[10].mxu1 }
 0x185   : > { %v1002_v17 = vadd.f32 %v1865_v37, %v624_v15  ;;  %v1034_v18 = vadd.f32 %v1865_v37, %v720_v16  ;;  %v626_v19 = vpop.f32.mrb[11].mxu0  ;;  %v722_v20 = vpop.f32.mrb[11].mxu1 }
 0x186   : > { %v1003_v21 = vadd.f32 %v1867_v38, %v626_v19  ;;  %v1035_v22 = vadd.f32 %v1867_v38, %v722_v20 }
 0x187   : > { %1066 = vst [vmem:[%s1875_s24 + $0x50] sm:$0xff] %v1002_v17  ;;  %1098 = vst [vmem:[%s1875_s24 + $0x150] sm:$0xff] %v1034_v18 }
 0x188   : > { %1067 = vst [vmem:[%s1875_s24 + $0x58] sm:$0xff] %v1003_v21  ;;  %1099 = vst [vmem:[%s1875_s24 + $0x158] sm:$0xff] %v1035_v22  ;;  %v630_v23 = vpop.f32.mrb[12].mxu0  ;;  %v726_v24 = vpop.f32.mrb[12].mxu1 }
 0x189   : > { %v1004_v25 = vadd.f32 %v1865_v37, %v630_v23  ;;  %v1036_v26 = vadd.f32 %v1865_v37, %v726_v24  ;;  %v632_v27 = vpop.f32.mrb[13].mxu0  ;;  %v728_v28 = vpop.f32.mrb[13].mxu1 }
 0x18a   : > { %v1005_v29 = vadd.f32 %v1867_v38, %v632_v27  ;;  %v1037_v30 = vadd.f32 %v1867_v38, %v728_v28 }
 0x18b   : > { %1068 = vst [vmem:[%s1875_s24 + $0x60] sm:$0xff] %v1004_v25  ;;  %1100 = vst [vmem:[%s1875_s24 + $0x160] sm:$0xff] %v1036_v26 }
 0x18c   : > { %1069 = vst [vmem:[%s1875_s24 + $0x68] sm:$0xff] %v1005_v29  ;;  %1101 = vst [vmem:[%s1875_s24 + $0x168] sm:$0xff] %v1037_v30  ;;  %v636_v31 = vpop.f32.mrb[14].mxu0  ;;  %v732_v32 = vpop.f32.mrb[14].mxu1 }
 0x18d   : > { %v1006_v33 = vadd.f32 %v1865_v37, %v636_v31  ;;  %v1038_v34 = vadd.f32 %v1865_v37, %v732_v32  ;;  %v638_v35 = vpop.f32.mrb[15].mxu0  ;;  %v734_v36 = vpop.f32.mrb[15].mxu1 }
 0x18e   : > { %v1007_v39 = vadd.f32 %v1867_v38, %v638_v35  ;;  %v1039_v40 = vadd.f32 %v1867_v38, %v734_v36 }
 0x18f   : > { %1070 = vst [vmem:[%s1875_s24 + $0x70] sm:$0xff] %v1006_v33  ;;  %1102 = vst [vmem:[%s1875_s24 + $0x170] sm:$0xff] %v1038_v34 }
 0x190   : > { %1071 = vst [vmem:[%s1875_s24 + $0x78] sm:$0xff] %v1007_v39  ;;  %1103 = vst [vmem:[%s1875_s24 + $0x178] sm:$0xff] %v1039_v40  ;;  %v642_v41 = vpop.f32.mrb[16].mxu0  ;;  %v738_v42 = vpop.f32.mrb[16].mxu1 }
 0x191   : > { %v1008_v43 = vadd.f32 %v1865_v37, %v642_v41  ;;  %v1040_v44 = vadd.f32 %v1865_v37, %v738_v42  ;;  %v644_v45 = vpop.f32.mrb[17].mxu0  ;;  %v740_v46 = vpop.f32.mrb[17].mxu1 }
 0x192   : > { %v1009_v47 = vadd.f32 %v1867_v38, %v644_v45  ;;  %v1041_v48 = vadd.f32 %v1867_v38, %v740_v46 }
 0x193   : > { %1072 = vst [vmem:[%s1875_s24 + $0x80] sm:$0xff] %v1008_v43  ;;  %1104 = vst [vmem:[%s1875_s24 + $0x180] sm:$0xff] %v1040_v44 }
 0x194   : > { %1073 = vst [vmem:[%s1875_s24 + $0x88] sm:$0xff] %v1009_v47  ;;  %1105 = vst [vmem:[%s1875_s24 + $0x188] sm:$0xff] %v1041_v48  ;;  %v648_v49 = vpop.f32.mrb[18].mxu0  ;;  %v744_v50 = vpop.f32.mrb[18].mxu1 }
 0x195   : > { %v1010_v51 = vadd.f32 %v1865_v37, %v648_v49  ;;  %v1042_v52 = vadd.f32 %v1865_v37, %v744_v50  ;;  %v650_v53 = vpop.f32.mrb[19].mxu0  ;;  %v746_v54 = vpop.f32.mrb[19].mxu1 }
 0x196   : > { %v1011_v55 = vadd.f32 %v1867_v38, %v650_v53  ;;  %v1043_v56 = vadd.f32 %v1867_v38, %v746_v54 }
 0x197   : > { %1074 = vst [vmem:[%s1875_s24 + $0x90] sm:$0xff] %v1010_v51  ;;  %1106 = vst [vmem:[%s1875_s24 + $0x190] sm:$0xff] %v1042_v52 }
 0x198   : > { %1075 = vst [vmem:[%s1875_s24 + $0x98] sm:$0xff] %v1011_v55  ;;  %1107 = vst [vmem:[%s1875_s24 + $0x198] sm:$0xff] %v1043_v56  ;;  %v654_v57 = vpop.f32.mrb[20].mxu0  ;;  %v750_v58 = vpop.f32.mrb[20].mxu1 }
 0x199   : > { %v1012_v59 = vadd.f32 %v1865_v37, %v654_v57  ;;  %v1044_v60 = vadd.f32 %v1865_v37, %v750_v58  ;;  %v656_v61 = vpop.f32.mrb[21].mxu0  ;;  %v752_v62 = vpop.f32.mrb[21].mxu1 }
 0x19a   : > { %v1013_v63 = vadd.f32 %v1867_v38, %v656_v61  ;;  %v1045_v0 = vadd.f32 %v1867_v38, %v752_v62 }
 0x19b   : > { %1076 = vst [vmem:[%s1875_s24 + $0xa0] sm:$0xff] %v1012_v59  ;;  %1108 = vst [vmem:[%s1875_s24 + $0x1a0] sm:$0xff] %v1044_v60 }
 0x19c   : > { %1077 = vst [vmem:[%s1875_s24 + $0xa8] sm:$0xff] %v1013_v63  ;;  %1109 = vst [vmem:[%s1875_s24 + $0x1a8] sm:$0xff] %v1045_v0  ;;  %v660_v1 = vpop.f32.mrb[22].mxu0  ;;  %v756_v2 = vpop.f32.mrb[22].mxu1 }
 0x19d   : > { %v1014_v3 = vadd.f32 %v1865_v37, %v660_v1  ;;  %v1046_v4 = vadd.f32 %v1865_v37, %v756_v2  ;;  %v662_v5 = vpop.f32.mrb[23].mxu0  ;;  %v758_v6 = vpop.f32.mrb[23].mxu1 }
 0x19e   : > { %v1015_v7 = vadd.f32 %v1867_v38, %v662_v5  ;;  %v1047_v8 = vadd.f32 %v1867_v38, %v758_v6 }
 0x19f   : > { %1078 = vst [vmem:[%s1875_s24 + $0xb0] sm:$0xff] %v1014_v3  ;;  %1110 = vst [vmem:[%s1875_s24 + $0x1b0] sm:$0xff] %v1046_v4 }
 0x1a0   : > { %1079 = vst [vmem:[%s1875_s24 + $0xb8] sm:$0xff] %v1015_v7  ;;  %1111 = vst [vmem:[%s1875_s24 + $0x1b8] sm:$0xff] %v1047_v8  ;;  %v666_v9 = vpop.f32.mrb[24].mxu0  ;;  %v762_v10 = vpop.f32.mrb[24].mxu1 }
 0x1a1   : > { %v1016_v11 = vadd.f32 %v1865_v37, %v666_v9  ;;  %v1048_v12 = vadd.f32 %v1865_v37, %v762_v10  ;;  %v668_v13 = vpop.f32.mrb[25].mxu0  ;;  %v764_v14 = vpop.f32.mrb[25].mxu1 }
 0x1a2   : > { %v1017_v15 = vadd.f32 %v1867_v38, %v668_v13  ;;  %v1049_v16 = vadd.f32 %v1867_v38, %v764_v14 }
 0x1a3   : > { %1080 = vst [vmem:[%s1875_s24 + $0xc0] sm:$0xff] %v1016_v11  ;;  %1112 = vst [vmem:[%s1875_s24 + $0x1c0] sm:$0xff] %v1048_v12 }
 0x1a4   : > { %1081 = vst [vmem:[%s1875_s24 + $0xc8] sm:$0xff] %v1017_v15  ;;  %1113 = vst [vmem:[%s1875_s24 + $0x1c8] sm:$0xff] %v1049_v16  ;;  %v672_v17 = vpop.f32.mrb[26].mxu0  ;;  %v768_v18 = vpop.f32.mrb[26].mxu1 }
 0x1a5   : > { %v1018_v19 = vadd.f32 %v1865_v37, %v672_v17  ;;  %v1050_v20 = vadd.f32 %v1865_v37, %v768_v18  ;;  %v674_v21 = vpop.f32.mrb[27].mxu0  ;;  %v770_v22 = vpop.f32.mrb[27].mxu1 }
 0x1a6   : > { %v1019_v23 = vadd.f32 %v1867_v38, %v674_v21  ;;  %v1051_v24 = vadd.f32 %v1867_v38, %v770_v22 }
 0x1a7   : > { %1082 = vst [vmem:[%s1875_s24 + $0xd0] sm:$0xff] %v1018_v19  ;;  %1114 = vst [vmem:[%s1875_s24 + $0x1d0] sm:$0xff] %v1050_v20 }
 0x1a8   : > { %1083 = vst [vmem:[%s1875_s24 + $0xd8] sm:$0xff] %v1019_v23  ;;  %1115 = vst [vmem:[%s1875_s24 + $0x1d8] sm:$0xff] %v1051_v24  ;;  %v678_v25 = vpop.f32.mrb[28].mxu0  ;;  %v774_v26 = vpop.f32.mrb[28].mxu1 }
 0x1a9   : > { %v1020_v27 = vadd.f32 %v1865_v37, %v678_v25  ;;  %v1052_v28 = vadd.f32 %v1865_v37, %v774_v26  ;;  %v680_v29 = vpop.f32.mrb[29].mxu0  ;;  %v776_v30 = vpop.f32.mrb[29].mxu1 }
 0x1aa   : > { %v1021_v31 = vadd.f32 %v1867_v38, %v680_v29  ;;  %v1053_v32 = vadd.f32 %v1867_v38, %v776_v30 }
 0x1ab   : > { %1084 = vst [vmem:[%s1875_s24 + $0xe0] sm:$0xff] %v1020_v27  ;;  %1116 = vst [vmem:[%s1875_s24 + $0x1e0] sm:$0xff] %v1052_v28 }
 0x1ac   : > { %1085 = vst [vmem:[%s1875_s24 + $0xe8] sm:$0xff] %v1021_v31  ;;  %1117 = vst [vmem:[%s1875_s24 + $0x1e8] sm:$0xff] %v1053_v32  ;;  %v684_v33 = vpop.f32.mrb[30].mxu0  ;;  %v780_v34 = vpop.f32.mrb[30].mxu1 }
 0x1ad   : > { %v1022_v35 = vadd.f32 %v1865_v37, %v684_v33  ;;  %v1054_v36 = vadd.f32 %v1865_v37, %v780_v34  ;;  %v686_v39 = vpop.f32.mrb[31].mxu0  ;;  %v782_v40 = vpop.f32.mrb[31].mxu1 }
 0x1ae   : > { %v1023_v41 = vadd.f32 %v1867_v38, %v686_v39  ;;  %v1055_v42 = vadd.f32 %v1867_v38, %v782_v40 }
 0x1af   : > { %1086 = vst [vmem:[%s1875_s24 + $0xf0] sm:$0xff] %v1022_v35  ;;  %1118 = vst [vmem:[%s1875_s24 + $0x1f0] sm:$0xff] %v1054_v36 }
 0x1b0   : > { %1087 = vst [vmem:[%s1875_s24 + $0xf8] sm:$0xff] %v1023_v41  ;;  %1119 = vst [vmem:[%s1875_s24 + $0x1f8] sm:$0xff] %v1055_v42 }
 0x1b1   : > { %1522 = shalt.err (!%p1519_p5)
}
 0x1b2   : > { %s1523_s6 = scalar_lea.hbm %s2000_s18, 8192  ;;  %s1527_s19 = scalar_lea.hbm %s2060_s3, 16384 }
 0x1b3   : > { %p1524_p9 = scmp.ne.s32.totalorder %s2000_s18, %s1523_s6  ;;  %p1528_p3 = scmp.lt.u32.totalorder %s2000_s18, %s2060_s3 }
 0x1b4   : > { %p1529_p7 = scmp.lt.u32.totalorder %s1527_s19, %s1523_s6  ;;  %p1531_p4 = scmp.lt.u32.totalorder %s1523_s6, %s2000_s18 }
 0x1b5   : > { %p1525_p1 = pnand %p1524_p9, %p1723_p10 }
 0x1b6   : > { %p1530_p13 = por %p1529_p7, %p1528_p3 }
 0x1b7   : > { %p1526_p2 = pneg %p1525_p1 }
 0x1b8   : > { %p1532_p6 = por %p1531_p4, %p1530_p13 }
 0x1ba   : > { %p1533_p8 = pnand %p1532_p6, %p1526_p2 }
 0x1bc   : > { %1536 = shalt.err (!%p1533_p8)
}
 0x1bd   : > { %s1602_s24 = smov 256   ;;  %s1603_s10 = smov 16  }
 0x1be   : > { %1380 = dma.vmem_to_hbm [thread:$0]  (%p1723_p10), %s2002_s11, 8192, %s2000_s18, %s1121_s25, %s1602_s24, %s1602_s24, %s1603_s10  }
 0x1bf PF: > { %s1152_s15 = sand.u32 1, %s1575_s12   ;;  %p2078_p12 = scmp.ne.s32.totalorder %s2068_s23, 0 }
 0x1c0   : > { %p2079_p11 = scmp.ge.s32.totalorder %s1595_s17, 2  ;;  %s1153_s9 = scalar_lea.sflag [#allocation5], %s1152_s15 }
 0x1c2   : > { %p1391_p0 = pnand %p2079_p11, %p2078_p12 }
 0x1c4   : > { %1570 = dma.done.wait (!%p1391_p0), %s1153_s9, 8192  }
 0x1c5   : > { %1572 = vsyncadd (!%p1391_p0), %s1153_s9, 4294959104  ;;  %s20_s17 = sadd.s32 1, %s1595_s17   ;;  %s2080_s12 = smov %s1579_s13 }
 0x1c6   : > { %p17_p5 = scmp.ge.s32.totalorder %s20_s17, 4   ;;  %s2081_s13 = smov %s1583_s14 }
 0x1c7   : > { %s2082_s14 = smov %s1732_s5  ;;  %s2083_s15 = smov %s1591_s16 }
 0x1c8   : > { %s2084_s16 = smov %s2086_s28  ;;  %19 = sbr.rel (!%p17_p5) target bundleno = 7 (0x7), region = 93 }
 0x1cf   :  { %1158 = vsyncpa [#allocation4], 1 }
 0x1d0   :  { %1160 = vsyncpa [#allocation4 + $0x1], 1 }
 0x1d1   :  { %1161 = vsyncpa [#allocation7], 1 }
 0x1d2   :  { %1162 = vsyncpa [#allocation5], 1 }
 0x1d3   :  { %1164 = vsyncpa [#allocation5 + $0x1], 1 }

</bundles_post_ra>
